<compile_context>
chip_gen: v6e
topology: v6e:2x2x1
jax: 0.10.0
libtpu: 0.0.40
codegen_flags: <defaults>
</compile_context>

<pallas_src>
import math

import jax
import jax.numpy as jnp
from jax.experimental import pallas as pl
from jax.experimental.pallas import tpu as pltpu


def _drop_path_kernel(scale_ref, x_ref, o_ref):
    """One (tb, tf) tile: out = x * per_sample_scale (scale is (tb, 1), broadcast)."""
    o_ref[...] = x_ref[...] * scale_ref[...]


def _round_up(x, m):
    return -(-x // m) * m


def _pick_tiles(B, F, itemsize, target_bytes=4 << 20):
    """Pick (tb, tf) so one VMEM block (including sublane padding) is ~target_bytes.

    tf is a multiple of 128 (or the full feature dim), tb is a multiple of the sublane
    padding granule (or the full batch).  Ragged last tiles are handled by pl.cdiv +
    Pallas masking, so neither axis needs to divide evenly.
    """
    sub_pad = {4: 8, 2: 16, 1: 32}.get(itemsize, 8)  # VMEM sublane padding granule

    # Feature tile: lane-dense, capped so that even a one-sublane-group batch tile
    # stays within the per-block budget.
    if F < 128:
        tf = F  # full dim (legal layout even when not a multiple of 128)
    else:
        tf_cap = max(128, (target_bytes // (sub_pad * itemsize)) // 128 * 128)
        if _round_up(F, 128) <= tf_cap:
            tf = F          # whole feature axis fits one block (full-dim = legal)
        else:
            tf = tf_cap     # multiple of 128; ragged last tile handled by cdiv

    # Batch tile: fill the remaining per-block budget.
    rows = target_bytes // max(1, tf * itemsize)
    rows = max(sub_pad, (rows // sub_pad) * sub_pad)
    tb = B if B <= rows else rows
    return tb, tf


def drop_path_forward(x, *, drop_prob, seed, training=True, block_bytes=4 << 20):
    """DropPath forward.  x: (B, ...) any rank; returns same shape/dtype."""
    if drop_prob is None or drop_prob == 0.0 or not training:
        return x

    keep_prob = 1.0 - float(drop_prob)
    B = x.shape[0]
    F = math.prod(x.shape[1:]) if x.ndim > 1 else 1
    x2 = x.reshape(B, F)  # free for contiguous inputs: no extra HBM round-trip

    # Per-sample 0/1 scaled mask, computed once outside the kernel (B*4 bytes):
    #   floor(keep_prob + u) == 1  <=>  u >= drop_prob
    # Multiplication happens in the input dtype (closer to PyTorch's in-dtype math,
    # and native bf16 on v6e/v7x VPUs).
    u = jax.random.uniform(jax.random.PRNGKey(seed), (B, 1), dtype=jnp.float32)
    scale = jnp.where(u >= drop_prob, 1.0 / keep_prob, 0.0).astype(x.dtype)

    tb, tf = _pick_tiles(B, F, x.dtype.itemsize, target_bytes=block_bytes)
    grid = (pl.cdiv(B, tb), pl.cdiv(F, tf))

    out = pl.pallas_call(
        _drop_path_kernel,
        out_shape=jax.ShapeDtypeStruct((B, F), x.dtype),
        grid=grid,
        in_specs=[
            pl.BlockSpec((tb, 1), lambda i, j: (i, 0)),   # per-sample scale
            pl.BlockSpec((tb, tf), lambda i, j: (i, j)),  # x tile
        ],
        out_specs=pl.BlockSpec((tb, tf), lambda i, j: (i, j)),
        compiler_params=pltpu.CompilerParams(
            dimension_semantics=("parallel", "parallel"),
            vmem_limit_bytes=48 << 20,  # 6 buffers of <=~4 MiB padded + headroom
        ),
        cost_estimate=pl.CostEstimate(
            flops=B * F,
            transcendentals=0,
            bytes_accessed=2 * B * F * x.dtype.itemsize + B * x.dtype.itemsize),
    )(scale, x2)

    return out.reshape(x.shape)


if __name__ == "__main__":
    key = jax.random.PRNGKey(0)
    k1, k2, k3 = jax.random.split(key, 3)

    drop_prob = 0.3
    keep_prob = 1.0 - drop_prob

    # Case 1: small 4-D tensor (B, C, H, W) = (2, 4, 16, 16) -> F = 1024, single block.
    x = jax.random.normal(k1, (2, 4, 16, 16), dtype=jnp.float32)
    y = jax.block_until_ready(
        drop_path_forward(x, drop_prob=drop_prob, seed=0, training=True))
    assert y.shape == x.shape and y.dtype == x.dtype
    for b in range(x.shape[0]):
        kept = bool(jnp.allclose(y[b], x[b] / keep_prob, atol=1e-5, rtol=1e-5))
        dropped = bool(jnp.allclose(y[b], 0.0))
        assert kept or dropped, f"sample {b}: output is not a per-sample 0/1 scaled copy"

    # Case 2: token tensor (B, N, C) = (4, 8, 512) -> F = 4096.  A small block budget
    # forces a multi-tile feature grid, verifying the per-sample scale stays consistent
    # across grid steps.
    x2 = jax.random.normal(k2, (4, 8, 512), dtype=jnp.float32)
    y2 = jax.block_until_ready(
        drop_path_forward(x2, drop_prob=drop_prob, seed=7, training=True,
                          block_bytes=64 << 10))
    for b in range(x2.shape[0]):
        kept = bool(jnp.allclose(y2[b], x2[b] / keep_prob, atol=1e-5, rtol=1e-5))
        dropped = bool(jnp.allclose(y2[b], 0.0))
        assert kept or dropped, f"sample {b}: mask inconsistent across feature tiles"

    # Case 3: bf16 input with F not a multiple of 128 (in-dtype multiply path).
    x3 = jax.random.normal(k3, (12, 3, 70), dtype=jnp.bfloat16)
    y3 = jax.block_until_ready(
        drop_path_forward(x3, drop_prob=drop_prob, seed=11, training=True))
    x3f = x3.astype(jnp.float32)
    y3f = y3.astype(jnp.float32)
    for b in range(x3.shape[0]):
        kept = bool(jnp.allclose(y3f[b], x3f[b] / keep_prob, atol=5e-2, rtol=2e-2))
        dropped = bool(jnp.allclose(y3f[b], 0.0))
        assert kept or dropped, f"sample {b}: bf16 output is not a 0/1 scaled copy"

    # Eval mode / drop_prob == 0.0 are identity pass-throughs (as in the module).
    assert jnp.array_equal(
        drop_path_forward(x, drop_prob=drop_prob, seed=0, training=False), x)
    assert jnp.array_equal(
        drop_path_forward(x, drop_prob=0.0, seed=0, training=True), x)

    # TODO(synk): the torch.rand stream is replaced by jax.random, so the drop mask is
    # not bitwise-identical to PyTorch (distributionally equivalent).  Callers must pass
    # a distinct seed per DropPath instance / training step.
    print("KERNEL_OK")
</pallas_src>

<mosaic_0001>
module attributes {stable_mosaic.version = 11 : i64} {
  func.func @_drop_path_kernel(%arg0: i32, %arg1: i32, %arg2: memref<2x1xf32, #tpu.memory_space<vmem>>, %arg3: memref<2x1024xf32, #tpu.memory_space<vmem>>, %arg4: memref<2x1024xf32, #tpu.memory_space<vmem>>) attributes {dimension_semantics = [#tpu.dimension_semantics<parallel>, #tpu.dimension_semantics<parallel>], iteration_bounds = array<i64: 1, 1>, scalar_prefetch = 0 : i64, scratch_operands = 0 : i64, tpu.core_type = #tpu.core_type<tc>, window_params = [{transform_indices = @transform_0, window_bounds = array<i64: 2, 1>}, {transform_indices = @transform_1, window_bounds = array<i64: 2, 1024>}, {transform_indices = @transform_2, window_bounds = array<i64: 2, 1024>}]} {
    %c0 = arith.constant 0 : index
    %c0_0 = arith.constant 0 : index
    %0 = vector.load %arg3[%c0, %c0_0] : memref<2x1024xf32, #tpu.memory_space<vmem>>, vector<2x1024xf32>
    %c0_1 = arith.constant 0 : index
    %c0_2 = arith.constant 0 : index
    %1 = vector.load %arg2[%c0_1, %c0_2] : memref<2x1xf32, #tpu.memory_space<vmem>>, vector<2x1xf32>
    %2 = vector.broadcast %1 : vector<2x1xf32> to vector<2x1024xf32>
    %3 = arith.mulf %0, %2 : vector<2x1024xf32>
    %c0_3 = arith.constant 0 : index
    %c0_4 = arith.constant 0 : index
    %4 = vector.load %arg4[%c0_3, %c0_4] : memref<2x1024xf32, #tpu.memory_space<vmem>>, vector<2x1024xf32>
    tpu.vector_store %arg4[%c0_3, %c0_4], %3 {strides = array<i32>} : memref<2x1024xf32, #tpu.memory_space<vmem>>, vector<2x1024xf32>,
    return
  }
  func.func @transform_0(%arg0: i32, %arg1: i32) -> (i32, i32) {
    %c0_i32 = arith.constant 0 : i32
    %c0_i32_0 = arith.constant 0 : i32
    return %arg0, %c0_i32 : i32, i32
  }
  func.func @transform_1(%arg0: i32, %arg1: i32) -> (i32, i32) {
    %c0_i32 = arith.constant 0 : i32
    return %arg0, %arg1 : i32, i32
  }
  func.func @transform_2(%arg0: i32, %arg1: i32) -> (i32, i32) {
    %c0_i32 = arith.constant 0 : i32
    return %arg0, %arg1 : i32, i32
  }
}

</mosaic_0001>

<bundles_post_ra>
// kernel: tpu_custom_call.1
= control target key start
LH: loop header
LB: loop body
LE: loop exit
PB: predicated region body
PF: predicated region fallthrough
CT: control target
= control target key end

     0   :  { %7 = vsyncpa [#allocation3], 0  ;;  %s135_s0 = inlined_call_operand.vmem [shape: f32[2,1], index: 0, kind: input, shape index: {}]   ;;  %s136_s1 = inlined_call_operand.hbm [shape: f32[2,1024], index: 1, kind: input, shape index: {}]   ;;  %s137_s2 = inlined_call_operand.hbm [shape: f32[2,1024], index: 2, kind: output, shape index: {}]  }
   0x1   :  { %8 = vsyncpa [#allocation4], 0  ;;  %s107_s9 = smov [#allocation2]  }
   0x2   :  { %s17_s10 = sshll.u32 %s107_s9, 4  ;;  %s18_s10 = int_to_ptr.vmem [resolvable:$true] %s17_s10 }
   0x3   :  { %s71_s11 = scalar_lea.vmem %s18_s10, 256  ;;  %p76_p1 = scmp.lt.s32.totalorder %s18_s10, %s18_s10 }
   0x4   :  { %p72_p0 = scmp.ne.s32.totalorder %s18_s10, %s71_s11  ;;  %p77_p2 = scmp.lt.s32.totalorder %s71_s11, %s71_s11 }
   0x6   :  { %p78_p3 = por %p77_p2, %p76_p1 }
   0x8   :  { %p79_p4 = pnand %p78_p3, %p72_p0 }
   0xa   :  { %82 = shalt.err (!%p79_p4)
}
   0xb   :  { %20 = dma.hbm_to_vmem [thread:$0]  %s136_s1, 256, %s18_s10, [#allocation3]  }
   0xc   :  { %103 = dma.done.wait [#allocation3], 256  }
   0xd   :  { %104 = vsyncadd [#allocation3], 4294967040  ;;  %v108_v0 = vmov 0   ;;  %v26_v1 = vld [vmem:[%s135_s0] sm:$0x3]  ;;  %v34_v4 = vlaneseq  ;;  %v25_v10 = vld [vmem:[#allocation2 + $0x8] sm:$0xff] }
   0xe   :  { %62 = vset.pattern.permute.xlu0 %v108_v0  ;;  %v109_v2 = vmov 269488144   ;;  %v24_v9 = vld [vmem:[#allocation2] sm:$0xff]  ;;  %s110_s16 = smov [#allocation5]  }
   0xf   :  { %29 = vperm.xlu0 %62, %v26_v1   ;;  %v32_v3 = vunpack.c.l.s4 %v109_v2  ;;  %v35_v6 = vshrl.u32 %v34_v4, 7  ;;  %s49_s1 = sshll.u32 %s110_s16, 4  ;;  %s50_s1 = int_to_ptr.vmem [resolvable:$true] %s49_s1 }
  0x10   :  { %s83_s17 = scalar_lea.vmem %s50_s1, 256  ;;  %p88_p6 = scmp.lt.s32.totalorder %s50_s1, %s50_s1 }
  0x11   :  { %v33_v5 = vunpack.c.0.s8 %v32_v3  ;;  %p84_p5 = scmp.ne.s32.totalorder %s50_s1, %s83_s17  ;;  %p89_p7 = scmp.lt.s32.totalorder %s83_s17, %s83_s17 }
  0x13   :  { %v36_v7 = vsub.s32 %v33_v5, %v35_v6  ;;  %p90_p8 = por %p89_p7, %p88_p6 }
  0x15   :  { %p91_p9 = pnand %p90_p8, %p84_p5 }
  0x8a   :  { %v30_v8 = vpop.permute.xlu0 %29 }
  0x8b   :  { %v37_v11 = vrot.slane %v30_v8, %v36_v7 }
  0x8d   :  { %v39_v12 = vmul.f32 %v37_v11, %v24_v9  ;;  %v40_v13 = vmul.f32 %v37_v11, %v25_v10 }
  0x8f   :  { %41 = vst [vmem:[#allocation5] sm:$0xff] %v39_v12  ;;  %42 = vst [vmem:[#allocation5 + $0x8] sm:$0xff] %v40_v13 }
  0x90   :  { %94 = shalt.err (!%p91_p9)
}
  0x91   :  { %52 = dma.vmem_to_hbm [thread:$0]  %s50_s1, 256, %s137_s2, [#allocation4]  }
  0x92   :  { %105 = dma.done.wait [#allocation4], 256  }
  0x93   :  { %106 = vsyncadd [#allocation4], 4294967040 }
  0x94   :  { %56 = vsyncpa [#allocation3], 1 }
  0x95   :  { %57 = vsyncpa [#allocation4], 1 }

</bundles_post_ra>
